<compile_context>
chip_gen: v5e
topology: v5e:2x2
jax: 0.10.0
libtpu: 0.0.40
codegen_flags: <defaults>
</compile_context>

<pallas_src>
import jax
import jax.numpy as jnp
from jax.experimental import pallas as pl
from jax.experimental.pallas import tpu as pltpu


_LANES = 128
# Candidate row-tile sizes (multiples of 8). 2048 rows x 128 lanes x 4 B = 1 MiB.
_TILE_ROW_CANDIDATES = (2048, 1024, 512, 256, 128, 64, 32, 16, 8)


def _identity_copy_kernel(x_ref, o_ref):
    # Straight VMEM copy of the current lane-dense tile.
    o_ref[...] = x_ref[...]


def _choose_tile_rows(rows: int) -> int:
    """Largest candidate tile row-count that evenly divides `rows`."""
    for cand in _TILE_ROW_CANDIDATES:
        if rows % cand == 0:
            return cand
    # rows is always a multiple of 8 after padding, so we never reach here.
    return rows


@jax.jit
def _pallas_identity(x: jax.Array) -> jax.Array:
    """Identity implemented as a tiled, lane-dense Pallas copy kernel."""
    orig_shape = x.shape
    total = x.size

    if total == 0:
        return x  # nothing to copy

    # Flatten and pad to a multiple of (8 * 128) so the 2D view is always
    # (8,128)-tileable — no masked-store / whole-array fallback paths.
    flat = x.reshape(-1)
    pad = (-total) % (8 * _LANES)
    if pad:
        flat = jnp.pad(flat, (0, pad))

    rows = flat.size // _LANES
    x2d = flat.reshape(rows, _LANES)

    tile_rows = _choose_tile_rows(rows)  # up to 2048 -> ~1 MiB f32 tiles
    grid = (rows // tile_rows,)

    y2d = pl.pallas_call(
        _identity_copy_kernel,
        out_shape=jax.ShapeDtypeStruct((rows, _LANES), x.dtype),
        grid_spec=pltpu.PrefetchScalarGridSpec(
            num_scalar_prefetch=0,
            grid=grid,
            in_specs=[pl.BlockSpec((tile_rows, _LANES), lambda i: (i, 0))],
            out_specs=pl.BlockSpec((tile_rows, _LANES), lambda i: (i, 0)),
        ),
        compiler_params=pltpu.CompilerParams(
            dimension_semantics=("parallel",),
        ),
        # Let the output reuse the input HBM buffer when XLA can donate it.
        input_output_aliases={0: 0},
    )(x2d)

    y = y2d.reshape(-1)
    if pad:
        y = y[:total]
    return y.reshape(orig_shape)


class MyModuleJAX:
    """JAX equivalent of the PyTorch MyModule.

    By default (materialize=False) this is a pure pass-through: no kernel is
    launched, matching the zero-cost semantics of the PyTorch module.
    Set materialize=True to force a Pallas copy of the input.
    """

    def __init__(self, output_key=None, materialize: bool = False):
        self.output_key = output_key
        self.materialize = materialize
        # No parameters to initialize (the PyTorch module has none).

    def __call__(self, x):
        y = _pallas_identity(x) if self.materialize else x
        if self.output_key is None:
            return y
        return {self.output_key: y}


if __name__ == "__main__":
    key = jax.random.PRNGKey(0)
    # Small NCHW-like input consistent with a generic module input.
    x = jax.random.normal(key, (2, 4, 16, 16), dtype=jnp.float32)

    # Exercise the Pallas copy kernel once and verify bit-exactness.
    y_copy = _pallas_identity(x)
    jax.block_until_ready(y_copy)
    assert y_copy.shape == x.shape and y_copy.dtype == x.dtype
    assert bool(jnp.all(y_copy == x))

    # Case 1: output_key=None -> identity passthrough (no kernel launch).
    m_none = MyModuleJAX(output_key=None)
    y = m_none(x)
    jax.block_until_ready(y)
    assert y.shape == x.shape and y.dtype == x.dtype
    assert bool(jnp.all(y == x))

    # Case 2: output_key set -> dict wrapping (no kernel launch).
    m_key = MyModuleJAX(output_key="out")
    d = m_key(x)
    jax.block_until_ready(d["out"])
    assert set(d.keys()) == {"out"}
    assert bool(jnp.all(d["out"] == x))

    # Case 3: materialized path goes through the Pallas kernel.
    m_mat = MyModuleJAX(output_key="out", materialize=True)
    d2 = m_mat(x)
    jax.block_until_ready(d2["out"])
    assert bool(jnp.all(d2["out"] == x))

    print("KERNEL_OK")
</pallas_src>

<mosaic_0001>
module attributes {stable_mosaic.version = 11 : i64} {
  func.func @_identity_copy_kernel(%arg0: i32, %arg1: memref<16x128xf32, #tpu.memory_space<vmem>>, %arg2: memref<16x128xf32, #tpu.memory_space<vmem>>) attributes {dimension_semantics = [#tpu.dimension_semantics<parallel>], iteration_bounds = array<i64: 1>, scalar_prefetch = 0 : i64, scratch_operands = 0 : i64, tpu.core_type = #tpu.core_type<tc>, window_params = [{transform_indices = @transform_0, window_bounds = array<i64: 16, 128>}, {transform_indices = @transform_1, window_bounds = array<i64: 16, 128>}]} {
    %c0 = arith.constant 0 : index
    %c0_0 = arith.constant 0 : index
    %0 = vector.load %arg1[%c0, %c0_0] : memref<16x128xf32, #tpu.memory_space<vmem>>, vector<16x128xf32>
    %c0_1 = arith.constant 0 : index
    %c0_2 = arith.constant 0 : index
    %1 = vector.load %arg2[%c0_1, %c0_2] : memref<16x128xf32, #tpu.memory_space<vmem>>, vector<16x128xf32>
    tpu.vector_store %arg2[%c0_1, %c0_2], %0 {strides = array<i32>} : memref<16x128xf32, #tpu.memory_space<vmem>>, vector<16x128xf32>,
    return
  }
  func.func @transform_0(%arg0: i32) -> (i32, i32) {
    %c0_i32 = arith.constant 0 : i32
    %c0_i32_0 = arith.constant 0 : i32
    return %arg0, %c0_i32 : i32, i32
  }
  func.func @transform_1(%arg0: i32) -> (i32, i32) {
    %c0_i32 = arith.constant 0 : i32
    %c0_i32_0 = arith.constant 0 : i32
    return %arg0, %c0_i32 : i32, i32
  }
}

</mosaic_0001>

<bundles_post_ra>
// kernel: _pallas_identity.1
= control target key start
LH: loop header
LB: loop body
LE: loop exit
PB: predicated region body
PF: predicated region fallthrough
CT: control target
= control target key end

     0   :  { %s38_s0 = inlined_call_operand.vmem [shape: f32[16,128], index: 0, kind: input, shape index: {}, may-alias: {0,1}]   ;;  %s39_s1 = inlined_call_operand.vmem [shape: f32[16,128], index: 1, kind: output, shape index: {}, may-alias: {0,1}]  }
   0x1   :  { %v8_v0 = vld [vmem:[%s38_s0] sm:$0xff]  ;;  %v9_v1 = vld [vmem:[%s38_s0 + $0x8] sm:$0xff] }
   0x2   :  { %10 = vst [vmem:[%s39_s1] sm:$0xff] %v8_v0 }
   0x3   :  { %11 = vst [vmem:[%s39_s1 + $0x8] sm:$0xff] %v9_v1 }

</bundles_post_ra>
